<compile_context>
chip_gen: v7x
topology: tpu7x:2x2x1
jax: 0.10.0
libtpu: 0.0.40
codegen_flags: <defaults>
</compile_context>

<pallas_src>
import jax
import jax.numpy as jnp
from jax.experimental import pallas as pl
from jax.experimental.pallas import tpu as pltpu

IMAGE_SIZE = 28 * 28
HIDDEN1 = 100
HIDDEN2 = 50
NUMBER_OF_LABELS = 10

LANE = 128
H1P = 128            # HIDDEN1 padded to lane width
H2P = 128            # HIDDEN2 padded to lane width
OUTP = 128           # NUMBER_OF_LABELS padded to lane width
MAX_BLOCK_B = 2048   # batch rows per grid step (256-aligned for large batches)


def _round_up(n, m):
    return ((n + m - 1) // m) * m


def _choose_block_b(B):
    """Pick the batch tile size.

    Goals (from the perf review):
      * big tiles to amortize the ~0.35 us per-grid-step overhead,
      * at least 2 grid steps when the batch allows it, so the "parallel"
        batch axis shards across v7x's two TensorCores,
      * rows a multiple of 8 (sublane) — or the full batch when B < 8.
    """
    B = max(B, 1)
    if B < 8:
        return B                                   # block == full dim (legal)
    if B <= 512:
        half = _round_up(-(-B // 2), 8)            # split in two 8-aligned tiles
        return half if half < B else _round_up(B, 8)
    half = _round_up(-(-B // 2), 256)              # 256-aligned, >= 2 steps
    return min(MAX_BLOCK_B, half)


def _modela_kernel(x_ref, w0_ref, b0_ref, w1_ref, b1_ref, w2_ref, b2_ref, out_ref):
    # Cast x to bf16 in VMEM (feedback: fold the convert into the kernel so the
    # wrapper doesn't add a whole extra HBM pass over x).
    x = x_ref[...].astype(jnp.bfloat16)

    # fc0: (TB, 784)bf16 @ (784, 128)bf16 -> f32 accumulate, + bias, ReLU.
    h = jnp.dot(x, w0_ref[...], preferred_element_type=jnp.float32)
    h = jnp.maximum(h + b0_ref[...], 0.0)

    # fc1: (TB, 128) @ (128, 128). Padded lanes of h are exactly 0 and rows
    # 100..127 of w1 are 0, so padding contributes nothing.
    h = jnp.dot(h.astype(jnp.bfloat16), w1_ref[...], preferred_element_type=jnp.float32)
    h = jnp.maximum(h + b1_ref[...], 0.0)

    # fc2: (TB, 128) @ (128, 128) -> padded logits.
    logits = jnp.dot(h.astype(jnp.bfloat16), w2_ref[...], preferred_element_type=jnp.float32)
    logits = logits + b2_ref[...]

    # Mask padded logit lanes (>= 10) to -inf so they don't corrupt the LSE.
    lane = jax.lax.broadcasted_iota(jnp.int32, logits.shape, 1)
    logits = jnp.where(lane < NUMBER_OF_LABELS, logits, -jnp.inf)

    # log_softmax along the feature (lane) axis, in f32; store bf16 (lane-dense).
    m = jnp.max(logits, axis=1, keepdims=True)
    shifted = logits - m
    lse = jnp.log(jnp.sum(jnp.exp(shifted), axis=1, keepdims=True))
    out_ref[...] = (shifted - lse).astype(out_ref.dtype)


@jax.jit
def modela_forward(x, packed):
    """x: (B, 1, 28, 28) or anything flattening to (B, 784). Returns (B, 10) f32 log-probs."""
    xf = x.reshape(-1, IMAGE_SIZE).astype(jnp.float32)   # == x.view(-1, image_size); no-op for f32 input
    B = xf.shape[0]

    block_b = _choose_block_b(B)
    grid = (pl.cdiv(B, block_b),)                        # ragged last block handled by Pallas

    out = pl.pallas_call(
        _modela_kernel,
        out_shape=jax.ShapeDtypeStruct((B, OUTP), jnp.bfloat16),
        grid=grid,
        in_specs=[
            pl.BlockSpec((block_b, IMAGE_SIZE), lambda i: (i, 0)),   # x tile (f32; cast in-kernel)
            pl.BlockSpec((IMAGE_SIZE, H1P), lambda i: (0, 0)),       # w0 (VMEM-resident)
            pl.BlockSpec((1, H1P), lambda i: (0, 0)),                # b0
            pl.BlockSpec((H1P, H2P), lambda i: (0, 0)),              # w1
            pl.BlockSpec((1, H2P), lambda i: (0, 0)),                # b1
            pl.BlockSpec((H2P, OUTP), lambda i: (0, 0)),             # w2
            pl.BlockSpec((1, OUTP), lambda i: (0, 0)),               # b2
        ],
        out_specs=pl.BlockSpec((block_b, OUTP), lambda i: (i, 0)),   # lane-dense bf16 output
        compiler_params=pltpu.CompilerParams(
            dimension_semantics=("parallel",),           # megacore-shardable batch axis
            vmem_limit_bytes=48 * 1024 * 1024,           # large f32 x tiles on v5e's 16 MiB default
        ),
    )(xf, packed["w0"], packed["b0"], packed["w1"], packed["b1"],
      packed["w2"], packed["b2"])

    # Tiny fused slice + upcast; padded lanes/rows never leave this wrapper.
    return out[:, :NUMBER_OF_LABELS].astype(jnp.float32)


def init_params(key):
    """PyTorch nn.Linear default init (U[-1/sqrt(fan_in), 1/sqrt(fan_in)]),
    weights stored transposed vs. torch, i.e. (in_features, out_features)."""
    ks = jax.random.split(key, 6)

    def linear(kw, kb, fan_in, fan_out):
        bound = 1.0 / jnp.sqrt(float(fan_in))
        w = jax.random.uniform(kw, (fan_in, fan_out), jnp.float32, -bound, bound)
        b = jax.random.uniform(kb, (fan_out,), jnp.float32, -bound, bound)
        return w, b

    w0, b0 = linear(ks[0], ks[1], IMAGE_SIZE, HIDDEN1)
    w1, b1 = linear(ks[2], ks[3], HIDDEN1, HIDDEN2)
    w2, b2 = linear(ks[4], ks[5], HIDDEN2, NUMBER_OF_LABELS)
    return {"w0": w0, "b0": b0, "w1": w1, "b1": b1, "w2": w2, "b2": b2}


def pack_params(params):
    """Zero-pad feature dims to the 128-lane width; weights bf16 for the MXU,
    biases f32 (added after the f32 accumulation)."""
    def pad_w(w, out_p, in_p=None):
        fi, fo = w.shape
        in_p = fi if in_p is None else in_p
        return jnp.pad(w, ((0, in_p - fi), (0, out_p - fo))).astype(jnp.bfloat16)

    def pad_b(b, out_p):
        return jnp.pad(b, (0, out_p - b.shape[0])).reshape(1, out_p).astype(jnp.float32)

    return {
        "w0": pad_w(params["w0"], H1P),
        "b0": pad_b(params["b0"], H1P),
        "w1": pad_w(params["w1"], H2P, H1P),
        "b1": pad_b(params["b1"], H2P),
        "w2": pad_w(params["w2"], OUTP, H2P),
        "b2": pad_b(params["b2"], OUTP),
    }


def modela_reference(x, params, match_bf16=False):
    """Plain-JAX reference; match_bf16=True mimics the kernel's bf16 MXU inputs
    and bf16-stored log-probs."""
    xf = x.reshape(-1, IMAGE_SIZE).astype(jnp.float32)
    w0, w1, w2 = params["w0"], params["w1"], params["w2"]
    if match_bf16:
        xf, w0, w1, w2 = (a.astype(jnp.bfloat16) for a in (xf, w0, w1, w2))

    h = jnp.maximum(jnp.dot(xf, w0, preferred_element_type=jnp.float32) + params["b0"], 0.0)
    h = h.astype(jnp.bfloat16) if match_bf16 else h
    h = jnp.maximum(jnp.dot(h, w1, preferred_element_type=jnp.float32) + params["b1"], 0.0)
    h = h.astype(jnp.bfloat16) if match_bf16 else h
    logits = jnp.dot(h, w2, preferred_element_type=jnp.float32) + params["b2"]
    out = jax.nn.log_softmax(logits, axis=1)
    if match_bf16:
        out = out.astype(jnp.bfloat16).astype(jnp.float32)   # mimic bf16 output store
    return out


if __name__ == "__main__":
    key = jax.random.PRNGKey(0)
    k_x, k_p = jax.random.split(key)

    # Small MNIST-like batch: (B, C, H, W) = (8, 1, 28, 28).
    x = jax.random.normal(k_x, (8, 1, 28, 28), dtype=jnp.float32)
    params = init_params(k_p)
    packed = pack_params(params)

    out = jax.block_until_ready(modela_forward(x, packed))
    assert out.shape == (8, NUMBER_OF_LABELS)
    assert bool(jnp.all(jnp.isfinite(out)))

    # Check vs. a reference matched to the kernel's bf16 MXU inputs + bf16 store.
    # Tolerance covers at most ~1 bf16 ulp of the stored log-probs (~0.016 here).
    ref_bf16 = modela_reference(x, params, match_bf16=True)
    assert jnp.allclose(out, ref_bf16, atol=3e-2, rtol=3e-2), "mismatch vs bf16-matched reference"

    # Loose check vs. the pure-f32 semantics of the PyTorch module.
    ref_f32 = modela_reference(x, params, match_bf16=False)
    assert jnp.allclose(out, ref_f32, atol=5e-2, rtol=5e-2), "mismatch vs f32 reference"

    # log_softmax rows should sum to ~1 in prob space (bf16 output rounding allowed).
    assert jnp.allclose(jnp.sum(jnp.exp(out), axis=1), 1.0, atol=2e-2)

    print("KERNEL_OK")
</pallas_src>

<mosaic_0001>
module attributes {stable_mosaic.version = 11 : i64} {
  func.func @_modela_kernel(%arg0: i32, %arg1: memref<8x784xf32, #tpu.memory_space<vmem>>, %arg2: memref<784x128xbf16, #tpu.memory_space<vmem>>, %arg3: memref<1x128xf32, #tpu.memory_space<vmem>>, %arg4: memref<128x128xbf16, #tpu.memory_space<vmem>>, %arg5: memref<1x128xf32, #tpu.memory_space<vmem>>, %arg6: memref<128x128xbf16, #tpu.memory_space<vmem>>, %arg7: memref<1x128xf32, #tpu.memory_space<vmem>>, %arg8: memref<8x128xbf16, #tpu.memory_space<vmem>>) attributes {dimension_semantics = [#tpu.dimension_semantics<parallel>], iteration_bounds = array<i64: 1>, scalar_prefetch = 0 : i64, scratch_operands = 0 : i64, tpu.core_type = #tpu.core_type<tc>, window_params = [{transform_indices = @transform_0, window_bounds = array<i64: 8, 784>}, {pipeline_mode = #tpu.pipeline_mode<synchronous>, transform_indices = @transform_1, window_bounds = array<i64: 784, 128>}, {pipeline_mode = #tpu.pipeline_mode<synchronous>, transform_indices = @transform_2, window_bounds = array<i64: 1, 128>}, {pipeline_mode = #tpu.pipeline_mode<synchronous>, transform_indices = @transform_3, window_bounds = array<i64: 128, 128>}, {pipeline_mode = #tpu.pipeline_mode<synchronous>, transform_indices = @transform_4, window_bounds = array<i64: 1, 128>}, {pipeline_mode = #tpu.pipeline_mode<synchronous>, transform_indices = @transform_5, window_bounds = array<i64: 128, 128>}, {pipeline_mode = #tpu.pipeline_mode<synchronous>, transform_indices = @transform_6, window_bounds = array<i64: 1, 128>}, {transform_indices = @transform_7, window_bounds = array<i64: 8, 128>}]} {
    %c0 = arith.constant 0 : index
    %c0_0 = arith.constant 0 : index
    %0 = vector.load %arg1[%c0, %c0_0] : memref<8x784xf32, #tpu.memory_space<vmem>>, vector<8x784xf32>
    %1 = arith.truncf %0 : vector<8x784xf32> to vector<8x784xbf16>
    %c0_1 = arith.constant 0 : index
    %c0_2 = arith.constant 0 : index
    %2 = vector.load %arg2[%c0_1, %c0_2] : memref<784x128xbf16, #tpu.memory_space<vmem>>, vector<784x128xbf16>
    %cst = arith.constant dense<0.000000e+00> : vector<8x128xf32>
    %3 = tpu.matmul %1, %2, %cst {dimension_numbers = #tpu.dot_dimension_numbers<[1], [0], [0], [1], [0, 0, 1, 1], [], []>} : vector<8x784xbf16>, vector<784x128xbf16>, vector<8x128xf32> -> vector<8x128xf32>
    %c0_3 = arith.constant 0 : index
    %c0_4 = arith.constant 0 : index
    %4 = vector.load %arg3[%c0_3, %c0_4] : memref<1x128xf32, #tpu.memory_space<vmem>>, vector<1x128xf32>
    %5 = vector.broadcast %4 : vector<1x128xf32> to vector<8x128xf32>
    %6 = arith.addf %3, %5 : vector<8x128xf32>
    %cst_5 = arith.constant 0.000000e+00 : f32
    %7 = vector.broadcast %cst_5 : f32 to vector<8x128xf32>
    %8 = arith.maximumf %6, %7 : vector<8x128xf32>
    %9 = arith.truncf %8 : vector<8x128xf32> to vector<8x128xbf16>
    %c0_6 = arith.constant 0 : index
    %c0_7 = arith.constant 0 : index
    %10 = vector.load %arg4[%c0_6, %c0_7] : memref<128x128xbf16, #tpu.memory_space<vmem>>, vector<128x128xbf16>
    %cst_8 = arith.constant dense<0.000000e+00> : vector<8x128xf32>
    %11 = tpu.matmul %9, %10, %cst_8 {dimension_numbers = #tpu.dot_dimension_numbers<[1], [0], [0], [1], [0, 0, 1, 1], [], []>} : vector<8x128xbf16>, vector<128x128xbf16>, vector<8x128xf32> -> vector<8x128xf32>
    %c0_9 = arith.constant 0 : index
    %c0_10 = arith.constant 0 : index
    %12 = vector.load %arg5[%c0_9, %c0_10] : memref<1x128xf32, #tpu.memory_space<vmem>>, vector<1x128xf32>
    %13 = vector.broadcast %12 : vector<1x128xf32> to vector<8x128xf32>
    %14 = arith.addf %11, %13 : vector<8x128xf32>
    %cst_11 = arith.constant 0.000000e+00 : f32
    %15 = vector.broadcast %cst_11 : f32 to vector<8x128xf32>
    %16 = arith.maximumf %14, %15 : vector<8x128xf32>
    %17 = arith.truncf %16 : vector<8x128xf32> to vector<8x128xbf16>
    %c0_12 = arith.constant 0 : index
    %c0_13 = arith.constant 0 : index
    %18 = vector.load %arg6[%c0_12, %c0_13] : memref<128x128xbf16, #tpu.memory_space<vmem>>, vector<128x128xbf16>
    %cst_14 = arith.constant dense<0.000000e+00> : vector<8x128xf32>
    %19 = tpu.matmul %17, %18, %cst_14 {dimension_numbers = #tpu.dot_dimension_numbers<[1], [0], [0], [1], [0, 0, 1, 1], [], []>} : vector<8x128xbf16>, vector<128x128xbf16>, vector<8x128xf32> -> vector<8x128xf32>
    %c0_15 = arith.constant 0 : index
    %c0_16 = arith.constant 0 : index
    %20 = vector.load %arg7[%c0_15, %c0_16] : memref<1x128xf32, #tpu.memory_space<vmem>>, vector<1x128xf32>
    %21 = vector.broadcast %20 : vector<1x128xf32> to vector<8x128xf32>
    %22 = arith.addf %19, %21 : vector<8x128xf32>
    %23 = tpu.iota {dimensions = array<i32: 1>} : vector<8x128xi32>
    %c10_i32 = arith.constant 10 : i32
    %24 = vector.broadcast %c10_i32 : i32 to vector<8x128xi32>
    %25 = arith.cmpi slt, %23, %24 : vector<8x128xi32>
    %cst_17 = arith.constant 0xFF800000 : f32
    %26 = vector.broadcast %cst_17 : f32 to vector<8x128xf32>
    %27 = arith.select %25, %22, %26 : vector<8x128xi1>, vector<8x128xf32>
    %cst_18 = arith.constant dense<0xFF800000> : vector<8xf32>
    %28 = vector.multi_reduction <maximumf>, %27, %cst_18 [1] : vector<8x128xf32> to vector<8xf32>
    %29 = vector.shape_cast %28 : vector<8xf32> to vector<8x1xf32>
    %30 = vector.broadcast %29 : vector<8x1xf32> to vector<8x128xf32>
    %31 = arith.subf %27, %30 : vector<8x128xf32>
    %32 = math.exp %31 : vector<8x128xf32>
    %cst_19 = arith.constant dense<0.000000e+00> : vector<8xf32>
    %33 = vector.multi_reduction <add>, %32, %cst_19 [1] : vector<8x128xf32> to vector<8xf32>
    %34 = vector.shape_cast %33 : vector<8xf32> to vector<8x1xf32>
    %35 = math.log %34 : vector<8x1xf32>
    %36 = vector.broadcast %35 : vector<8x1xf32> to vector<8x128xf32>
    %37 = arith.subf %31, %36 : vector<8x128xf32>
    %38 = arith.truncf %37 : vector<8x128xf32> to vector<8x128xbf16>
    %c0_20 = arith.constant 0 : index
    %c0_21 = arith.constant 0 : index
    %39 = vector.load %arg8[%c0_20, %c0_21] : memref<8x128xbf16, #tpu.memory_space<vmem>>, vector<8x128xbf16>
    tpu.vector_store %arg8[%c0_20, %c0_21], %38 {strides = array<i32>} : memref<8x128xbf16, #tpu.memory_space<vmem>>, vector<8x128xbf16>,
    return
  }
  func.func @transform_0(%arg0: i32) -> (i32, i32) {
    %c0_i32 = arith.constant 0 : i32
    %c0_i32_0 = arith.constant 0 : i32
    return %arg0, %c0_i32 : i32, i32
  }
  func.func @transform_1(%arg0: i32) -> (i32, i32) {
    %c0_i32 = arith.constant 0 : i32
    %c0_i32_0 = arith.constant 0 : i32
    %c0_i32_1 = arith.constant 0 : i32
    return %c0_i32, %c0_i32_0 : i32, i32
  }
  func.func @transform_2(%arg0: i32) -> (i32, i32) {
    %c0_i32 = arith.constant 0 : i32
    %c0_i32_0 = arith.constant 0 : i32
    %c0_i32_1 = arith.constant 0 : i32
    return %c0_i32, %c0_i32_0 : i32, i32
  }
  func.func @transform_3(%arg0: i32) -> (i32, i32) {
    %c0_i32 = arith.constant 0 : i32
    %c0_i32_0 = arith.constant 0 : i32
    %c0_i32_1 = arith.constant 0 : i32
    return %c0_i32, %c0_i32_0 : i32, i32
  }
  func.func @transform_4(%arg0: i32) -> (i32, i32) {
    %c0_i32 = arith.constant 0 : i32
    %c0_i32_0 = arith.constant 0 : i32
    %c0_i32_1 = arith.constant 0 : i32
    return %c0_i32, %c0_i32_0 : i32, i32
  }
  func.func @transform_5(%arg0: i32) -> (i32, i32) {
    %c0_i32 = arith.constant 0 : i32
    %c0_i32_0 = arith.constant 0 : i32
    %c0_i32_1 = arith.constant 0 : i32
    return %c0_i32, %c0_i32_0 : i32, i32
  }
  func.func @transform_6(%arg0: i32) -> (i32, i32) {
    %c0_i32 = arith.constant 0 : i32
    %c0_i32_0 = arith.constant 0 : i32
    %c0_i32_1 = arith.constant 0 : i32
    return %c0_i32, %c0_i32_0 : i32, i32
  }
  func.func @transform_7(%arg0: i32) -> (i32, i32) {
    %c0_i32 = arith.constant 0 : i32
    %c0_i32_0 = arith.constant 0 : i32
    return %arg0, %c0_i32 : i32, i32
  }
}

</mosaic_0001>

<bundles_post_ra>
// kernel: modela_forward.1
= control target key start
LH: loop header
LB: loop body
LE: loop exit
PB: predicated region body
PF: predicated region fallthrough
CT: control target
= control target key end

     0   :  { %v1122_v44 = vmov 0.0   ;;  %vm1123_vm0 = vmmov 0   ;;  %vm440_vm1 = vcmask 130048   ;;  %s1415_s1 = inlined_call_operand.vmem [shape: bf16[784,128], index: 1, kind: input, shape index: {}]   ;;  %s1416_s0 = inlined_call_operand.vmem [shape: f32[8,784], index: 0, kind: input, shape index: {}]   ;;  %s1417_s3 = inlined_call_operand.vmem [shape: bf16[128,128], index: 3, kind: input, shape index: {}]   ;;  %s1418_s5 = inlined_call_operand.vmem [shape: bf16[128,128], index: 5, kind: input, shape index: {}]   ;;  %s1419_s2 = inlined_call_operand.vmem [shape: f32[1,128], index: 2, kind: input, shape index: {}]   ;;  %s1420_s4 = inlined_call_operand.vmem [shape: f32[1,128], index: 4, kind: input, shape index: {}]   ;;  %s1421_s6 = inlined_call_operand.vmem [shape: f32[1,128], index: 6, kind: input, shape index: {}]   ;;  %s1422_s7 = inlined_call_operand.vmem [shape: bf16[8,128], index: 7, kind: output, shape index: {}]  }
   0x1   :  { %v1053_v0 = vld [vmem:[%s1415_s1 + $0x40] sm:$0xff]   ;;  %v1057_v4 = vld [vmem:[%s1415_s1 + $0x48] sm:$0xff]   ;;  %v1061_v8 = vld [vmem:[%s1415_s1 + $0x50] sm:$0xff]  }
   0x2   :  { %v1054_v1 = vld [vmem:[%s1415_s1] sm:$0xff]   ;;  %919 = vmatprep.subr.bf16.mxu0 %v1053_v0  ;;  %v1058_v5 = vld [vmem:[%s1415_s1 + $0x8] sm:$0xff]   ;;  %v1062_v9 = vld [vmem:[%s1415_s1 + $0x10] sm:$0xff]  }
   0x3   :  { %v1055_v2 = vld [vmem:[%s1415_s1 + $0xc0] sm:$0xff]   ;;  %920 = vmatpush3.bf16.msra.mxu0 %v1054_v1  ;;  %v1059_v6 = vld [vmem:[%s1415_s1 + $0xc8] sm:$0xff]   ;;  %v1063_v10 = vld [vmem:[%s1415_s1 + $0xd0] sm:$0xff]  }
   0x4   :  { %v1056_v3 = vld [vmem:[%s1415_s1 + $0x80] sm:$0xff]   ;;  %941 = vmatprep.subr.bf16.mxu1 %v1055_v2  ;;  %921 = vmatprep.subr.bf16.mxu0 %v1057_v4  ;;  %v1060_v7 = vld [vmem:[%s1415_s1 + $0x88] sm:$0xff]   ;;  %v1064_v11 = vld [vmem:[%s1415_s1 + $0x90] sm:$0xff]  }
   0x5   :  { %942 = vmatpush3.bf16.msra.mxu1 %v1056_v3  ;;  %v1065_v12 = vld [vmem:[%s1415_s1 + $0x58] sm:$0xff]   ;;  %v1069_v16 = vld [vmem:[%s1415_s1 + $0x60] sm:$0xff]   ;;  %v1073_v20 = vld [vmem:[%s1415_s1 + $0x68] sm:$0xff]  }
   0x6   :  { %943 = vmatprep.subr.bf16.mxu1 %v1059_v6  ;;  %v1066_v13 = vld [vmem:[%s1415_s1 + $0x18] sm:$0xff]   ;;  %v1070_v17 = vld [vmem:[%s1415_s1 + $0x20] sm:$0xff]   ;;  %v1074_v21 = vld [vmem:[%s1415_s1 + $0x28] sm:$0xff]  }
   0x7   :  { %922 = vmatpush3.bf16.msra.mxu0 %v1058_v5  ;;  %v1067_v14 = vld [vmem:[%s1415_s1 + $0xd8] sm:$0xff]   ;;  %v1071_v18 = vld [vmem:[%s1415_s1 + $0xe0] sm:$0xff]   ;;  %v1075_v22 = vld [vmem:[%s1415_s1 + $0xe8] sm:$0xff]  }
   0x8   :  { %923 = vmatprep.subr.bf16.mxu0 %v1061_v8  ;;  %v1068_v15 = vld [vmem:[%s1415_s1 + $0x98] sm:$0xff]   ;;  %v1072_v19 = vld [vmem:[%s1415_s1 + $0xa0] sm:$0xff]   ;;  %v1076_v23 = vld [vmem:[%s1415_s1 + $0xa8] sm:$0xff]  }
   0x9   :  { %944 = vmatpush3.bf16.msra.mxu1 %v1060_v7  ;;  %v1077_v24 = vld [vmem:[%s1415_s1 + $0x70] sm:$0xff]   ;;  %v1081_v28 = vld [vmem:[%s1415_s1 + $0x78] sm:$0xff]   ;;  %v28_v31 = vld [vmem:[%s1416_s0 + $0x8] sm:$0xff] }
   0xa   :  { %945 = vmatprep.subr.bf16.mxu1 %v1063_v10  ;;  %v1078_v25 = vld [vmem:[%s1415_s1 + $0x30] sm:$0xff]   ;;  %v1082_v29 = vld [vmem:[%s1415_s1 + $0x38] sm:$0xff]   ;;  %v35_v32 = vpack.c.bf16 %v28_v31, %v28_v31  ;;  %v27_v34 = vld [vmem:[%s1416_s0] sm:$0xff] }
   0xb   :  { %924 = vmatpush3.bf16.msra.mxu0 %v1062_v9  ;;  %v1079_v26 = vld [vmem:[%s1415_s1 + $0xf0] sm:$0xff]   ;;  %v1083_v30 = vld [vmem:[%s1415_s1 + $0xf8] sm:$0xff]   ;;  %v34_v35 = vpack.c.bf16 %v27_v34, %v27_v34  ;;  %v1085_v36 = vld [vmem:[%s1415_s1 + $0x140] sm:$0xff]  }
   0xc   :  { %925 = vmatprep.subr.bf16.mxu0 %v1065_v12  ;;  %v1080_v27 = vld [vmem:[%s1415_s1 + $0xb0] sm:$0xff]   ;;  %v1084_v33 = vld [vmem:[%s1415_s1 + $0xb8] sm:$0xff]   ;;  %476 = vmatprep.mubr.bf16.mxu0 %v35_v32  ;;  %v1086_v39 = vld [vmem:[%s1415_s1 + $0x100] sm:$0xff]  }
   0xd   :  { %946 = vmatpush3.bf16.msra.mxu1 %v1064_v11  ;;  %v30_v37 = vld [vmem:[%s1416_s0 + $0x18] sm:$0xff]  ;;  %v29_v40 = vld [vmem:[%s1416_s0 + $0x10] sm:$0xff]  ;;  %v1087_v42 = vld [vmem:[%s1415_s1 + $0x148] sm:$0xff]  }
   0xe   :  { %947 = vmatprep.subr.bf16.mxu1 %v1067_v14  ;;  %v37_v38 = vpack.c.bf16 %v30_v37, %v30_v37  ;;  %v36_v41 = vpack.c.bf16 %v29_v40, %v29_v40  ;;  %v1088_v43 = vld [vmem:[%s1415_s1 + $0x108] sm:$0xff]   ;;  %v1089_v45 = vld [vmem:[%s1415_s1 + $0x150] sm:$0xff]   ;;  %v1091_v47 = vld [vmem:[%s1415_s1 + $0x158] sm:$0xff]  }
   0xf   :  { %926 = vmatpush3.bf16.msra.mxu0 %v1066_v13  ;;  %v1090_v46 = vld [vmem:[%s1415_s1 + $0x110] sm:$0xff]   ;;  %v1092_v48 = vld [vmem:[%s1415_s1 + $0x118] sm:$0xff]   ;;  %v1093_v49 = vld [vmem:[%s1415_s1 + $0x160] sm:$0xff]  }
  0x10   :  { %927 = vmatprep.subr.bf16.mxu0 %v1069_v16  ;;  %516 = vmatprep.mubr.bf16.mxu1 %v37_v38  ;;  %v1094_v50 = vld [vmem:[%s1415_s1 + $0x120] sm:$0xff]   ;;  %v1095_v51 = vld [vmem:[%s1415_s1 + $0x168] sm:$0xff]   ;;  %v33_v55 = vld [vmem:[%s1416_s0 + $0x30] sm:$0xff] }
  0x11   :  { %948 = vmatpush3.bf16.msra.mxu1 %v1068_v15  ;;  %v1101_v52 = vld [vmem:[%s1415_s1 + $0x180] sm:$0xff]   ;;  %v32_v53 = vld [vmem:[%s1416_s0 + $0x28] sm:$0xff]  ;;  %v40_v57 = vpack.c.bf16 %v33_v55, %v33_v55  ;;  %v1097_v58 = vld [vmem:[%s1415_s1 + $0x170] sm:$0xff]  }
  0x12   :  { %949 = vmatprep.subr.bf16.mxu1 %v1071_v18  ;;  %v39_v54 = vpack.c.bf16 %v32_v53, %v32_v53  ;;  %v1096_v56 = vld [vmem:[%s1415_s1 + $0x128] sm:$0xff]   ;;  %v1098_v59 = vld [vmem:[%s1415_s1 + $0x130] sm:$0xff]   ;;  %v1099_v60 = vld [vmem:[%s1415_s1 + $0x178] sm:$0xff]  }
  0x13   :  { %928 = vmatpush3.bf16.msra.mxu0 %v1070_v17  ;;  %v1100_v61 = vld [vmem:[%s1415_s1 + $0x138] sm:$0xff]   ;;  %v31_v62 = vld [vmem:[%s1416_s0 + $0x20] sm:$0xff]  ;;  %v1103_v1 = vld [vmem:[%s1417_s3 + $0x8] sm:$0xff]  }
  0x14   :  { %929 = vmatprep.subr.bf16.mxu0 %v1073_v20  ;;  %v38_v63 = vpack.c.bf16 %v31_v62, %v31_v62  ;;  %v1102_v0 = vld [vmem:[%s1417_s3] sm:$0xff]   ;;  %v1104_v2 = vld [vmem:[%s1417_s3 + $0x10] sm:$0xff]   ;;  %v1105_v3 = vld [vmem:[%s1417_s3 + $0x18] sm:$0xff]  }
  0x15   :  { %950 = vmatpush3.bf16.msra.mxu1 %v1072_v19  ;;  %v1106_v4 = vld [vmem:[%s1417_s3 + $0x20] sm:$0xff]   ;;  %v1107_v5 = vld [vmem:[%s1417_s3 + $0x28] sm:$0xff]   ;;  %v1108_v6 = vld [vmem:[%s1417_s3 + $0x30] sm:$0xff]  }
  0x16   :  { %951 = vmatprep.subr.bf16.mxu1 %v1075_v22  ;;  %v1109_v7 = vld [vmem:[%s1417_s3 + $0x38] sm:$0xff]   ;;  %v1110_v8 = vld [vmem:[%s1418_s5] sm:$0xff]   ;;  %v1111_v9 = vld [vmem:[%s1418_s5 + $0x8] sm:$0xff]  }
  0x17   :  { %930 = vmatpush3.bf16.msra.mxu0 %v1074_v21  ;;  %v1112_v10 = vld [vmem:[%s1418_s5 + $0x10] sm:$0xff]   ;;  %v1113_v11 = vld [vmem:[%s1418_s5 + $0x18] sm:$0xff]   ;;  %v1114_v12 = vld [vmem:[%s1418_s5 + $0x20] sm:$0xff]  }
  0x18   :  { %931 = vmatprep.subr.bf16.mxu0 %v1077_v24  ;;  %v1115_v13 = vld [vmem:[%s1418_s5 + $0x28] sm:$0xff]   ;;  %v850_v15 = vld [vmem:[%s1419_s2] ss:$0 sm:$0xff]  ;;  %v1116_v40 = vld [vmem:[%s1418_s5 + $0x30] sm:$0xff]  }
  0x19   :  { %952 = vmatpush3.bf16.msra.mxu1 %v1076_v23 }
  0x1a   :  { %953 = vmatprep.subr.bf16.mxu1 %v1079_v26 }
  0x1b   :  { %932 = vmatpush3.bf16.msra.mxu0 %v1078_v25 }
  0x1c   :  { %933 = vmatprep.subr.bf16.mxu0 %v1081_v28 }
  0x1d   :  { %954 = vmatpush3.bf16.msra.mxu1 %v1080_v27 }
  0x1e   :  { %955 = vmatprep.subr.bf16.mxu1 %v1083_v30 }
  0x1f   :  { %934 = vmatpush3.bf16.msra.mxu0 %v1082_v29 }
  0x20   :  { %963 = vmatprep.subr.bf16.mxu0 %v1085_v36 }
  0x21   :  { %956 = vmatpush3.bf16.msra.mxu1 %v1084_v33 }
  0x22   :  { %477 = vmatmul.mubr.bf16.vlgmr.msra.gmra.mrb[0].mxu0 %v34_v35  ;;  %1005 = vmatprep.subr.bf16.mxu1 %v1122_v44 }
  0x23   :  { %964 = vmatpush3.bf16.msra.mxu0 %v1086_v39  ;;  %556 = vmatprep.mubr.bf16.mxu0 %v39_v54 }
  0x24   :  { %517 = vmatmul.mubr.bf16.vlgmr.msra.gmra.mrb[0].mxu1 %v36_v41  ;;  %965 = vmatprep.subr.bf16.mxu0 %v1087_v42  ;;  %v1117_v41 = vld [vmem:[%s1418_s5 + $0x38] sm:$0xff]   ;;  %v901_v42 = vld [vmem:[%s1420_s4] ss:$0 sm:$0xff] }
  0x25   :  { %1007 = vmatprep.mubr.msk.bf16.mxu1 %vm1123_vm0, %v1122_v44  ;;  %1006 = vmatpush3.bf16.msra.mxu1 %v1101_v52 }
  0x26   :  { %1011 = vmatprep.subr.bf16.mxu1 %v1122_v44 }
  0x27   :  { %966 = vmatpush3.bf16.msra.mxu0 %v1088_v43 }
  0x28   :  { %967 = vmatprep.subr.bf16.mxu0 %v1089_v45 }
  0x2b   :  { %968 = vmatpush3.bf16.msra.mxu0 %v1090_v46 }
  0x2c   :  { %969 = vmatprep.subr.bf16.mxu0 %v1091_v47  ;;  %1008 = vmatmul.mubr.msk.bf16.vlgmr.msra.gmra.mrb[4].mxu1 %vm440_vm1, %v40_v57 }
  0x2d   :  { %1027 = vmatprep.mubr.msk.bf16.mxu1 %vm1123_vm0, %v1122_v44  ;;  %1012 = vmatpush3.bf16.msra.mxu1 %v1102_v0 }
  0x2e   :  { %1013 = vmatprep.subr.bf16.mxu1 %v1122_v44 }
  0x2f   :  { %970 = vmatpush3.bf16.msra.mxu0 %v1092_v48 }
  0x30   :  { %971 = vmatprep.subr.bf16.mxu0 %v1093_v49 }
  0x31   :  { %1014 = vmatpush3.bf16.msra.mxu1 %v1103_v1 }
  0x32   :  { %1015 = vmatprep.subr.bf16.mxu1 %v1122_v44 }
  0x33   :  { %972 = vmatpush3.bf16.msra.mxu0 %v1094_v50 }
  0x34   :  { %973 = vmatprep.subr.bf16.mxu0 %v1095_v51  ;;  %v830_v51 = vlaneseq }
  0x35   :  { %1016 = vmatpush3.bf16.msra.mxu1 %v1104_v2 }
  0x36   :  { %1017 = vmatprep.subr.bf16.mxu1 %v1122_v44  ;;  %v831_v52 = vand.u32 127, %v830_v51 }
  0x37   :  { %974 = vmatpush3.bf16.msra.mxu0 %v1096_v56 }
  0x38   :  { %975 = vmatprep.subr.bf16.mxu0 %v1097_v58  ;;  %vm832_vm2 = vcmp.lt.s32.totalorder %v831_v52, 10 }
  0x39   :  { %1018 = vmatpush3.bf16.msra.mxu1 %v1105_v3 }
  0x3a   :  { %1019 = vmatprep.subr.bf16.mxu1 %v1122_v44 }
  0x3b   :  { %976 = vmatpush3.bf16.msra.mxu0 %v1098_v59 }
  0x3c   :  { %977 = vmatprep.subr.bf16.mxu0 %v1099_v60 }
  0x3d   :  { %1020 = vmatpush3.bf16.msra.mxu1 %v1106_v4 }
  0x3e   :  { %1021 = vmatprep.subr.bf16.mxu1 %v1122_v44 }
  0x3f   :  { %978 = vmatpush3.bf16.msra.mxu0 %v1100_v61 }
  0x40   :  { %1031 = vmatprep.subr.bf16.mxu0 %v1122_v44 }
  0x41   :  { %1022 = vmatpush3.bf16.msra.mxu1 %v1107_v5 }
  0x42   :  { %557 = vmatmul.mubr.bf16.vlgmr.msra.gmra.mrb[4].mxu0 %v38_v63  ;;  %1023 = vmatprep.subr.bf16.mxu1 %v1122_v44 }
  0x43   :  { %1047 = vmatprep.mubr.msk.bf16.mxu0 %vm1123_vm0, %v1122_v44  ;;  %1032 = vmatpush3.bf16.msra.mxu0 %v1110_v8 }
  0x44   :  { %1033 = vmatprep.subr.bf16.mxu0 %v1122_v44 }
  0x45   :  { %1024 = vmatpush3.bf16.msra.mxu1 %v1108_v6 }
  0x46   :  { %1025 = vmatprep.subr.bf16.mxu1 %v1122_v44 }
  0x47   :  { %1034 = vmatpush3.bf16.msra.mxu0 %v1111_v9 }
  0x48   :  { %1035 = vmatprep.subr.bf16.mxu0 %v1122_v44 }
  0x49   :  { %1026 = vmatpush3.bf16.msra.mxu1 %v1109_v7 }
  0x4b   :  { %1036 = vmatpush3.bf16.msra.mxu0 %v1112_v10 }
  0x4c   :  { %1037 = vmatprep.subr.bf16.mxu0 %v1122_v44 }
  0x4f   :  { %1038 = vmatpush3.bf16.msra.mxu0 %v1113_v11 }
  0x50   :  { %1039 = vmatprep.subr.bf16.mxu0 %v1122_v44 }
  0x53   :  { %1040 = vmatpush3.bf16.msra.mxu0 %v1114_v12 }
  0x54   :  { %1041 = vmatprep.subr.bf16.mxu0 %v1122_v44 }
  0x57   :  { %1042 = vmatpush3.bf16.msra.mxu0 %v1115_v13 }
  0x58   :  { %1043 = vmatprep.subr.bf16.mxu0 %v1122_v44 }
  0x5b   :  { %1044 = vmatpush3.bf16.msra.mxu0 %v1116_v40 }
  0x5c   :  { %1045 = vmatprep.subr.bf16.mxu0 %v1122_v44  ;;  %v910_v44 = vld [vmem:[%s1421_s6] ss:$0 sm:$0xff] }
  0x5f   :  { %1046 = vmatpush3.bf16.msra.mxu0 %v1117_v41 }
  0xf5   :  { %v935_v14 = vpop.f32.mrb[0].mxu0 }
  0xf6   :  { %v936_v16 = vpop.f32.mrb[1].mxu0 }
  0xf7   :  { %v937_v17 = vadd.f32 %v936_v16, %v935_v14  ;;  %v938_v18 = vpop.f32.mrb[2].mxu0  ;;  %v957_v19 = vpop.f32.mrb[0].mxu1 }
  0xf8   :  { %v939_v20 = vpop.f32.mrb[3].mxu0  ;;  %v958_v22 = vpop.f32.mrb[1].mxu1 }
  0xf9   :  { %v479_v21 = vadd.f32 %v937_v17, %v850_v15  ;;  %v959_v23 = vadd.f32 %v958_v22, %v957_v19  ;;  %v960_v24 = vpop.f32.mrb[2].mxu1 }
  0xfa   :  { %v961_v25 = vpop.f32.mrb[3].mxu1 }
  0xfb   :  { %v519_v26 = vadd.f32 %v959_v23, %v479_v21 }
  0xff   :  { %v598_v27 = vpop.f32.mrb[4].mxu1 }
 0x100   :  { %v1009_v28 = vpop.f32.mrb[5].mxu1 }
 0x101   :  { %v601_v29 = vpop.f32.mrb[6].mxu1 }
 0x102   :  { %v1010_v30 = vpop.f32.mrb[7].mxu1 }
 0x115   :  { %v979_v31 = vpop.f32.mrb[4].mxu0 }
 0x116   :  { %v980_v32 = vpop.f32.mrb[5].mxu0 }
 0x117   :  { %v981_v33 = vadd.f32 %v980_v32, %v979_v31  ;;  %v982_v34 = vpop.f32.mrb[6].mxu0 }
 0x118   :  { %v983_v35 = vpop.f32.mrb[7].mxu0 }
 0x119   :  { %v559_v36 = vadd.f32 %v981_v33, %v519_v26 }
 0x11b   :  { %v599_v37 = vadd.f32 %v598_v27, %v559_v36 }
 0x11d   :  { %v604_v38 = vmax.f32 %v599_v37, 0.0 }
 0x11f   :  { %v605_v39 = vpack.c.bf16 %v604_v38, %v604_v38 }
 0x121   :  { %1028 = vmatmul.mubr.bf16.vlgmr.msra.gmra.mrb[8].mxu1 %v605_v39 }
 0x1f4   :  { %v711_v43 = vpop.f32.mrb[8].mxu1 }
 0x1f5   :  { %v712_v45 = vadd.f32 %v901_v42, %v711_v43  ;;  %v1029_v46 = vpop.f32.mrb[9].mxu1 }
 0x1f6   :  { %v714_v47 = vpop.f32.mrb[10].mxu1 }
 0x1f7   :  { %v717_v48 = vmax.f32 %v712_v45, 0.0  ;;  %v1030_v49 = vpop.f32.mrb[11].mxu1 }
 0x1f9   :  { %v718_v50 = vpack.c.bf16 %v717_v48, %v717_v48 }
 0x1fb   :  { %1048 = vmatmul.mubr.bf16.vlgmr.msra.gmra.mrb[8].mxu0 %v718_v50 }
 0x2ce   :  { %v824_v53 = vpop.f32.mrb[8].mxu0 }
 0x2cf   :  { %v825_v54 = vadd.f32 %v910_v44, %v824_v53  ;;  %v1049_v55 = vpop.f32.mrb[9].mxu0 }
 0x2d0   :  { %v827_v56 = vpop.f32.mrb[10].mxu0 }
 0x2d1   :  { %v1050_v57 = vpop.f32.mrb[11].mxu0  ;;  %v833_v58 = vsel %vm832_vm2, %v825_v54, -inf }
 0x2d2   :  { %834 = vmax.xlane.f32.xlu0 %v833_v58 }
 0x35f   :  { %v835_v59 = vpop.xlane.xlu0 %834 }
 0x360   :  { %v836_v60 = vsub.f32 %v833_v58, %v835_v59 }
 0x362   :  { %v837_v61 = vmul.f32 1.442695, %v836_v60 }
 0x364   :  { %1118 = vpow2.f32 %v837_v61 }
 0x36e   :  { %v1119_v62 = vpop.eup %1118 }
 0x36f   :  { %839 = vadd.xlane.f32.xlu0 %v1119_v62 }
 0x3fc   :  { %v840_v63 = vpop.xlane.xlu0 %839 }
 0x3fd   :  { %1120 = vlog2.f32 %v840_v63 }
 0x407   :  { %v1121_v0 = vpop.eup %1120 }
 0x408   :  { %v842_v1 = vmul.f32 0.6931472, %v1121_v0 }
 0x40a   :  { %v843_v2 = vsub.f32 %v836_v60, %v842_v1 }
 0x40c   :  { %v844_v3 = vpack.c.bf16 %v843_v2, %v843_v2 }
 0x40e   :  { %845 = vst [vmem:[%s1422_s7] sm:$0xf] %v844_v3 }

</bundles_post_ra>
